<compile_context>
chip_gen: v6e
topology: v6e:2x2x1
jax: 0.10.0
libtpu: 0.0.40
codegen_flags: <defaults>
</compile_context>

<pallas_src>
import functools
import math

import jax
import jax.numpy as jnp
from jax.experimental import pallas as pl
from jax.experimental.pallas import tpu as pltpu


def _swishc_kernel(x_ref, o_ref, *, beta, cap):
    # Single upcast to f32 (matches torch promotion of x against the f32 cap
    # tensor); sigmoid's exp goes to the EUP, mul/select to the VPU.
    x = x_ref[...].astype(jnp.float32)
    bx = x if beta == 1.0 else x * jnp.float32(beta)  # skip dead mul for beta==1
    swish = x * jax.nn.sigmoid(bx)
    out = jnp.where(x < jnp.float32(cap), swish, jnp.float32(cap))
    o_ref[...] = out.astype(o_ref.dtype)


def _round_down_mult(x, m):
    return (x // m) * m


def _sublane_for(itemsize):
    # Minimum sublane tile for the dtype's packing: (8,128) f32, (16,128)
    # bf16/f16, (32,128) int8/fp8.
    if itemsize >= 4:
        return 8
    if itemsize == 2:
        return 16
    return 32


@functools.lru_cache(maxsize=1)
def _min_grid_steps():
    # >= 8 grid steps only matters on 2-TensorCore parts (v7x class); on
    # single-TC v5e/v6e, 3-4 steps is enough for the software pipeline.
    try:
        kind = jax.devices()[0].device_kind.lower()
    except Exception:
        return 4
    return 8 if "7" in kind else 4


def _pick_layout(total, itemsize, min_steps):
    """Choose (lanes, block_rows, rows, grid_steps, padded_total)."""
    # Widest lane-dense last dim that divides the flat size (pad-free path);
    # otherwise lanes=128 and pad only to the next multiple of 128.
    lanes = 128
    for cand in (1024, 512, 256, 128):
        if total % cand == 0:
            lanes = cand
            break
    padded_total = -(-total // lanes) * lanes
    rows = padded_total // lanes

    sub = _sublane_for(itemsize)

    # ~4 MiB per tile: with default 2x input + 2x output buffering that is
    # ~16 MiB of pipelined VMEM, under the 32 MiB scoped limit everywhere.
    target = max(sub, _round_down_mult((4 << 20) // (lanes * itemsize), sub))

    if rows <= target:
        # Small array: one full-extent block (full-dim block is legal even if
        # rows is not a multiple of the sublane tile).
        return lanes, rows, rows, 1, padded_total

    # Large array: keep at least `min_steps` grid steps, but never shrink the
    # tile below one sublane tile.  Partial edge block is masked by Pallas.
    cap_rows = max(sub, _round_down_mult(-(-rows // min_steps), sub))
    block_rows = max(sub, min(target, cap_rows))
    grid_steps = -(-rows // block_rows)
    return lanes, block_rows, rows, grid_steps, padded_total


def _swishc_impl(x, beta=1.0, cap=10.0):
    orig_shape = x.shape
    orig_dtype = x.dtype
    total = math.prod(orig_shape) if orig_shape else 1
    if total == 0:
        return x

    itemsize = jnp.dtype(orig_dtype).itemsize
    lanes, block_rows, rows, grid_steps, padded_total = _pick_layout(
        total, itemsize, _min_grid_steps())

    x_flat = x.reshape(-1)
    if padded_total != total:
        # Only for total % 128 != 0; pads at most 127 elements.
        x_flat = jnp.pad(x_flat, (0, padded_total - total))
    x2d = x_flat.reshape(rows, lanes)

    kernel = functools.partial(_swishc_kernel, beta=float(beta), cap=float(cap))

    out2d = pl.pallas_call(
        kernel,
        out_shape=jax.ShapeDtypeStruct((rows, lanes), orig_dtype),
        grid_spec=pltpu.PrefetchScalarGridSpec(
            num_scalar_prefetch=0,
            grid=(grid_steps,),
            in_specs=[pl.BlockSpec((block_rows, lanes), lambda i: (i, 0))],
            out_specs=pl.BlockSpec((block_rows, lanes), lambda i: (i, 0)),
        ),
        compiler_params=pltpu.CompilerParams(
            dimension_semantics=("parallel",),
            vmem_limit_bytes=32 << 20,  # safe on v5e / v6e / v7x
        ),
        cost_estimate=pl.CostEstimate(
            flops=5 * padded_total,
            transcendentals=padded_total,
            bytes_accessed=2 * padded_total * itemsize,
        ),
        input_output_aliases={0: 0},  # donate x2d: elementwise, same shape/dtype
    )(x2d)

    out_flat = out2d.reshape(-1)
    if padded_total != total:
        out_flat = out_flat[:total]
    return out_flat.reshape(orig_shape)


# Under jit the flatten/reshape are bitcasts and the donation makes the whole
# op a true in-place HBM update; beta/cap are static (Python floats).
swishc = jax.jit(_swishc_impl, static_argnames=("beta", "cap"), donate_argnums=0)


def swishc_ref(x, beta=1.0, cap=10.0):
    """Pure-JAX reference matching the PyTorch module."""
    return jnp.where(x < cap, x * jax.nn.sigmoid(beta * x),
                     jnp.asarray(cap, x.dtype))


if __name__ == "__main__":
    key = jax.random.PRNGKey(0)
    # NCHW input consistent with a CNN activation: batch=2, channels=4, 16x16.
    x = jax.random.normal(key, (2, 4, 16, 16), dtype=jnp.float32) * 8.0
    beta, cap = 1.0, 10.0

    # Reference first: x is donated to the jitted kernel.
    ref = swishc_ref(x, beta=beta, cap=cap)
    orig_shape, orig_dtype = x.shape, x.dtype

    out = swishc(x, beta=beta, cap=cap)
    out = jax.block_until_ready(out)

    assert out.shape == orig_shape and out.dtype == orig_dtype
    assert jnp.allclose(out, ref, atol=1e-6, rtol=1e-6)

    print("KERNEL_OK")
</pallas_src>

<mosaic_0001>
module attributes {stable_mosaic.version = 11 : i64} {
  func.func @_swishc_kernel(%arg0: i32, %arg1: memref<2x1024xf32, #tpu.memory_space<vmem>>, %arg2: memref<2x1024xf32, #tpu.memory_space<vmem>>) attributes {dimension_semantics = [#tpu.dimension_semantics<parallel>], iteration_bounds = array<i64: 1>, scalar_prefetch = 0 : i64, scratch_operands = 0 : i64, tpu.core_type = #tpu.core_type<tc>, window_params = [{transform_indices = @transform_0, window_bounds = array<i64: 2, 1024>}, {transform_indices = @transform_1, window_bounds = array<i64: 2, 1024>}]} {
    %c0 = arith.constant 0 : index
    %c0_0 = arith.constant 0 : index
    %0 = vector.load %arg1[%c0, %c0_0] : memref<2x1024xf32, #tpu.memory_space<vmem>>, vector<2x1024xf32>
    %1 = arith.negf %0 : vector<2x1024xf32>
    %2 = math.exp %1 : vector<2x1024xf32>
    %cst = arith.constant 1.000000e+00 : f32
    %3 = vector.broadcast %cst : f32 to vector<2x1024xf32>
    %4 = arith.addf %3, %2 : vector<2x1024xf32>
    %5 = arith.divf %3, %4 : vector<2x1024xf32>
    %6 = arith.mulf %0, %5 : vector<2x1024xf32>
    %cst_1 = arith.constant 1.000000e+01 : f32
    %7 = vector.broadcast %cst_1 : f32 to vector<2x1024xf32>
    %8 = arith.cmpf olt, %0, %7 : vector<2x1024xf32>
    %cst_2 = arith.constant 1.000000e+01 : f32
    %9 = vector.broadcast %cst_2 : f32 to vector<2x1024xf32>
    %10 = arith.select %8, %6, %9 : vector<2x1024xi1>, vector<2x1024xf32>
    %c0_3 = arith.constant 0 : index
    %c0_4 = arith.constant 0 : index
    %11 = vector.load %arg2[%c0_3, %c0_4] : memref<2x1024xf32, #tpu.memory_space<vmem>>, vector<2x1024xf32>
    tpu.vector_store %arg2[%c0_3, %c0_4], %10 {strides = array<i32>} : memref<2x1024xf32, #tpu.memory_space<vmem>>, vector<2x1024xf32>,
    return
  }
  func.func @transform_0(%arg0: i32) -> (i32, i32) {
    %c0_i32 = arith.constant 0 : i32
    %c0_i32_0 = arith.constant 0 : i32
    return %arg0, %c0_i32 : i32, i32
  }
  func.func @transform_1(%arg0: i32) -> (i32, i32) {
    %c0_i32 = arith.constant 0 : i32
    %c0_i32_0 = arith.constant 0 : i32
    return %arg0, %c0_i32 : i32, i32
  }
}

</mosaic_0001>

<bundles_post_ra>
// kernel: _swishc_impl.1
= control target key start
LH: loop header
LB: loop body
LE: loop exit
PB: predicated region body
PF: predicated region fallthrough
CT: control target
= control target key end

     0   :  { %s66_s0 = inlined_call_operand.vmem [shape: f32[2,1024], index: 0, kind: input, shape index: {}, may-alias: {0,1}]   ;;  %s67_s1 = inlined_call_operand.vmem [shape: f32[2,1024], index: 1, kind: output, shape index: {}, may-alias: {0,1}]  }
   0x1   :  { %v8_v0 = vld [vmem:[%s66_s0] sm:$0xff]  ;;  %v9_v1 = vld [vmem:[%s66_s0 + $0x8] sm:$0xff] }
   0x2   :  { %v34_v2 = vmul.f32 -1.442695, %v8_v0  ;;  %v35_v3 = vmul.f32 -1.442695, %v9_v1  ;;  %vm24_vm0 = vcmp.lt.f32.partialorder %v8_v0, 10.0  ;;  %vm25_vm1 = vcmp.lt.f32.partialorder %v9_v1, 10.0 }
   0x4   :  { %36 = vpow2.f32 %v34_v2 }
   0x5   :  { %38 = vpow2.f32 %v35_v3 }
  0x11   :  { %v37_v4 = vpop.eup %36 }
  0x12   :  { %v39_v5 = vpop.eup %38  ;;  %v16_v6 = vadd.f32 1.0, %v37_v4 }
  0x13   :  { %v17_v7 = vadd.f32 1.0, %v39_v5 }
  0x14   :  { %40 = vrcp.f32 %v16_v6 }
  0x15   :  { %42 = vrcp.f32 %v17_v7 }
  0x21   :  { %v41_v8 = vpop.eup %40 }
  0x22   :  { %v43_v9 = vpop.eup %42  ;;  %v22_v10 = vmul.f32 %v41_v8, %v8_v0 }
  0x23   :  { %v23_v11 = vmul.f32 %v43_v9, %v9_v1 }
  0x24   :  { %v26_v12 = vsel %vm24_vm0, %v22_v10, 10.0 }
  0x25   :  { %28 = vst [vmem:[%s67_s1] sm:$0xff] %v26_v12  ;;  %v27_v13 = vsel %vm25_vm1, %v23_v11, 10.0 }
  0x26   :  { %29 = vst [vmem:[%s67_s1 + $0x8] sm:$0xff] %v27_v13 }

</bundles_post_ra>
